<compile_context>
chip_gen: v7x
topology: tpu7x:2x2x1
jax: 0.10.0
libtpu: 0.0.40
codegen_flags: <defaults>
</compile_context>

<pallas_src>
import math
from functools import partial

import jax
import jax.numpy as jnp
from jax.experimental import pallas as pl
from jax.experimental.pallas import tpu as pltpu

_LOG_MIN_PROB = math.log(1e-4)  # clamp(prob, min=1e-4) expressed in log space


def _pow_spec(x, gamma):
    """x**gamma, specialized to VPU multiplies for small integer gamma."""
    g = float(gamma)
    if g == int(g) and 0 <= int(g) <= 4:
        gi = int(g)
        if gi == 0:
            return jnp.ones_like(x)
        r = x
        for _ in range(gi - 1):
            r = r * x
        return r
    return jnp.power(x, jnp.float32(g))


def _focal_loss_kernel(pred_ref, target_ref, alpha_ref, out_ref, acc_ref, *,
                       gamma, size_average, n_rows, tile_n):
    i = pl.program_id(0)

    @pl.when(i == 0)
    def _init():
        acc_ref[...] = jnp.zeros_like(acc_ref)

    logits = pred_ref[...].astype(jnp.float32)            # [C, TILE_N]
    tgt = target_ref[...]                                 # [1, TILE_N] int32
    alpha = alpha_ref[...].astype(jnp.float32)            # [C, 1]

    # log-softmax over the class (sublane) axis.
    m = jnp.max(logits, axis=0, keepdims=True)                         # [1, T]
    lse = m + jnp.log(jnp.sum(jnp.exp(logits - m), axis=0, keepdims=True))

    # One-hot gather of the target logit / alpha (scatter_ equivalent).
    cls = jax.lax.broadcasted_iota(jnp.int32, logits.shape, 0)         # [C, T]
    onehot = (cls == tgt).astype(jnp.float32)                          # [C, T]
    logit_t = jnp.sum(onehot * logits, axis=0, keepdims=True)          # [1, T]
    alpha_t = jnp.sum(onehot * alpha, axis=0, keepdims=True)           # [1, T]

    # clamp(prob, 1e-4, 1.0) in log space, then the focal term.
    logp_t = jnp.clip(logit_t - lse, jnp.float32(_LOG_MIN_PROB),
                      jnp.float32(0.0))
    p_t = jnp.exp(logp_t)
    loss = -alpha_t * _pow_spec(1.0 - p_t, gamma) * logp_t             # [1, T]

    # Mask the zero-padded tail columns of the last tile.
    col = jax.lax.broadcasted_iota(jnp.int32, loss.shape, 1) + i * tile_n
    loss = jnp.where(col < n_rows, loss, 0.0)

    acc_ref[...] += jnp.sum(loss, axis=1, keepdims=True)               # [1, 1]

    @pl.when(i == pl.num_programs(0) - 1)
    def _finish():
        if size_average:
            out_ref[...] = acc_ref[...] / jnp.float32(n_rows)
        else:
            out_ref[...] = acc_ref[...]


def _choose_tile_n(n_rows, class_num):
    """Lane tile over N: multiple of 128, ~2 MiB per pred block (fits the
    double-buffered pipeline on v7x's smaller VMEM as well as v5e/v6e)."""
    c_sublanes = max(8, ((class_num + 7) // 8) * 8)
    budget_bytes = 2 * 1024 * 1024
    max_tile = max(128, (budget_bytes // (c_sublanes * 4)) // 128 * 128)
    max_tile = min(max_tile, 32768)
    n_ceil = ((n_rows + 127) // 128) * 128
    return min(max_tile, n_ceil)


def focal_loss(pred, target, class_num, *, alpha=None, gamma=2.0,
               use_alpha=False, size_average=False):
    """JAX/Pallas equivalent of FocalLoss.forward(pred, target)."""
    pred2d = pred.reshape(-1, class_num)                 # [N, C], keep dtype
    n_rows = pred2d.shape[0]

    # Lane-dense layout: classes on sublanes, N on lanes.
    pred_t = pred2d.T                                    # [C, N]
    tgt_t = target.reshape(1, -1).astype(jnp.int32)      # [1, N]

    if use_alpha:
        alpha_arr = jnp.asarray(alpha, jnp.float32).reshape(class_num, 1)
    else:
        alpha_arr = jnp.ones((class_num, 1), jnp.float32)

    tile_n = _choose_tile_n(n_rows, class_num)
    num_tiles = pl.cdiv(n_rows, tile_n)
    n_pad = num_tiles * tile_n
    if n_pad != n_rows:
        pad = n_pad - n_rows
        pred_t = jnp.pad(pred_t, ((0, 0), (0, pad)))
        tgt_t = jnp.pad(tgt_t, ((0, 0), (0, pad)))

    kernel = partial(_focal_loss_kernel, gamma=float(gamma),
                     size_average=bool(size_average), n_rows=n_rows,
                     tile_n=tile_n)

    out = pl.pallas_call(
        kernel,
        out_shape=jax.ShapeDtypeStruct((1, 1), jnp.float32),
        grid_spec=pltpu.PrefetchScalarGridSpec(
            num_scalar_prefetch=0,
            grid=(num_tiles,),
            in_specs=[
                pl.BlockSpec((class_num, tile_n), lambda i: (0, i)),  # pred
                pl.BlockSpec((1, tile_n), lambda i: (0, i)),          # target
                pl.BlockSpec((class_num, 1), lambda i: (0, 0)),       # alpha
            ],
            out_specs=pl.BlockSpec((1, 1), lambda i: (0, 0)),
            scratch_shapes=[pltpu.VMEM((1, 1), jnp.float32)],
        ),
        compiler_params=pltpu.CompilerParams(
            dimension_semantics=("arbitrary",)),
    )(pred_t, tgt_t, alpha_arr)
    return out[0, 0]


def _reference_focal_loss(pred, target, class_num, *, alpha=None, gamma=2.0,
                          use_alpha=False, size_average=False):
    """Pure-JAX reference mirroring the PyTorch module."""
    logits = pred.reshape(-1, class_num).astype(jnp.float32)
    prob = jax.nn.softmax(logits, axis=1)
    prob = jnp.clip(prob, 0.0001, 1.0)
    onehot = jax.nn.one_hot(target.reshape(-1), class_num, dtype=jnp.float32)
    loss = -jnp.power(1.0 - prob, gamma) * jnp.log(prob) * onehot
    if use_alpha:
        loss = loss * jnp.asarray(alpha, jnp.float32).reshape(1, class_num)
    batch_loss = jnp.sum(loss, axis=1)
    return jnp.mean(batch_loss) if size_average else jnp.sum(batch_loss)


if __name__ == "__main__":
    class_num = 4
    batch = 16

    key = jax.random.PRNGKey(0)
    k_pred, k_tgt = jax.random.split(key)
    pred = jax.random.normal(k_pred, (batch, class_num), dtype=jnp.float32)
    target = jax.random.randint(k_tgt, (batch,), 0, class_num, dtype=jnp.int32)

    # Default config: no alpha, sum reduction.
    loss = focal_loss(pred, target, class_num, gamma=2.0,
                      use_alpha=False, size_average=False)
    loss = jax.block_until_ready(loss)
    ref = _reference_focal_loss(pred, target, class_num, gamma=2.0,
                                use_alpha=False, size_average=False)
    assert jnp.allclose(loss, ref, rtol=1e-5, atol=1e-5), (loss, ref)

    # Alpha-weighted, mean reduction.
    alpha = [0.1, 0.2, 0.3, 0.4]
    loss_a = focal_loss(pred, target, class_num, alpha=alpha, gamma=2.0,
                        use_alpha=True, size_average=True)
    loss_a = jax.block_until_ready(loss_a)
    ref_a = _reference_focal_loss(pred, target, class_num, alpha=alpha,
                                  gamma=2.0, use_alpha=True, size_average=True)
    assert jnp.allclose(loss_a, ref_a, rtol=1e-5, atol=1e-5), (loss_a, ref_a)

    print("KERNEL_OK")
</pallas_src>

<mosaic_0001>
module attributes {stable_mosaic.version = 11 : i64} {
  func.func @_focal_loss_kernel(%arg0: i32, %arg1: memref<4x128xf32, #tpu.memory_space<vmem>>, %arg2: memref<1x128xi32, #tpu.memory_space<vmem>>, %arg3: memref<4x1xf32, #tpu.memory_space<vmem>>, %arg4: memref<1x1xf32, #tpu.memory_space<vmem>>, %arg5: memref<1x1xf32, #tpu.memory_space<vmem>>) attributes {dimension_semantics = [#tpu.dimension_semantics<arbitrary>], iteration_bounds = array<i64: 1>, scalar_prefetch = 0 : i64, scratch_operands = 1 : i64, tpu.core_type = #tpu.core_type<tc>, window_params = [{transform_indices = @transform_0, window_bounds = array<i64: 4, 128>}, {transform_indices = @transform_1, window_bounds = array<i64: 1, 128>}, {pipeline_mode = #tpu.pipeline_mode<synchronous>, transform_indices = @transform_2, window_bounds = array<i64: 4, 1>}, {pipeline_mode = #tpu.pipeline_mode<synchronous>, transform_indices = @transform_3, window_bounds = array<i64: 1, 1>}]} {
    %c0_i32 = arith.constant 0 : i32
    %0 = arith.cmpi eq, %arg0, %c0_i32 : i32
    %1 = arith.extui %0 : i1 to i32
    %c0_i32_0 = arith.constant 0 : i32
    %2 = arith.cmpi ne, %1, %c0_i32_0 : i32
    scf.if %2 {
      %cst_21 = arith.constant 0.000000e+00 : f32
      %56 = vector.broadcast %cst_21 : f32 to vector<1x1xf32>
      %c0_22 = arith.constant 0 : index
      %c0_23 = arith.constant 0 : index
      %57 = vector.load %arg5[%c0_22, %c0_23] : memref<1x1xf32, #tpu.memory_space<vmem>>, vector<1x1xf32>
      tpu.vector_store %arg5[%c0_22, %c0_23], %56 {strides = array<i32>} : memref<1x1xf32, #tpu.memory_space<vmem>>, vector<1x1xf32>,
    } else {
    }
    %c0 = arith.constant 0 : index
    %c0_1 = arith.constant 0 : index
    %3 = vector.load %arg1[%c0, %c0_1] : memref<4x128xf32, #tpu.memory_space<vmem>>, vector<4x128xf32>
    %c0_2 = arith.constant 0 : index
    %c0_3 = arith.constant 0 : index
    %4 = vector.load %arg2[%c0_2, %c0_3] : memref<1x128xi32, #tpu.memory_space<vmem>>, vector<1x128xi32>
    %c0_4 = arith.constant 0 : index
    %c0_5 = arith.constant 0 : index
    %5 = vector.load %arg3[%c0_4, %c0_5] : memref<4x1xf32, #tpu.memory_space<vmem>>, vector<4x1xf32>
    %cst = arith.constant dense<0xFF800000> : vector<128xf32>
    %6 = vector.multi_reduction <maximumf>, %3, %cst [0] : vector<4x128xf32> to vector<128xf32>
    %7 = vector.shape_cast %6 : vector<128xf32> to vector<1x128xf32>
    %8 = vector.broadcast %7 : vector<1x128xf32> to vector<4x128xf32>
    %9 = arith.subf %3, %8 : vector<4x128xf32>
    %10 = math.exp %9 : vector<4x128xf32>
    %cst_6 = arith.constant dense<0.000000e+00> : vector<128xf32>
    %11 = vector.multi_reduction <add>, %10, %cst_6 [0] : vector<4x128xf32> to vector<128xf32>
    %12 = vector.shape_cast %11 : vector<128xf32> to vector<1x128xf32>
    %13 = math.log %12 : vector<1x128xf32>
    %14 = arith.addf %7, %13 : vector<1x128xf32>
    %15 = tpu.iota {dimensions = array<i32: 0>} : vector<4x128xi32>
    %16 = vector.broadcast %4 : vector<1x128xi32> to vector<4x128xi32>
    %17 = arith.cmpi eq, %15, %16 : vector<4x128xi32>
    %18 = arith.extui %17 : vector<4x128xi1> to vector<4x128xi32>
    %19 = arith.sitofp %18 : vector<4x128xi32> to vector<4x128xf32>
    %20 = arith.mulf %19, %3 : vector<4x128xf32>
    %cst_7 = arith.constant dense<0.000000e+00> : vector<128xf32>
    %21 = vector.multi_reduction <add>, %20, %cst_7 [0] : vector<4x128xf32> to vector<128xf32>
    %22 = vector.shape_cast %21 : vector<128xf32> to vector<1x128xf32>
    %23 = vector.broadcast %5 : vector<4x1xf32> to vector<4x128xf32>
    %24 = arith.mulf %19, %23 : vector<4x128xf32>
    %cst_8 = arith.constant dense<0.000000e+00> : vector<128xf32>
    %25 = vector.multi_reduction <add>, %24, %cst_8 [0] : vector<4x128xf32> to vector<128xf32>
    %26 = vector.shape_cast %25 : vector<128xf32> to vector<1x128xf32>
    %27 = arith.subf %22, %14 : vector<1x128xf32>
    %cst_9 = arith.constant -9.21034049 : f32
    %cst_10 = arith.constant 0.000000e+00 : f32
    %28 = vector.broadcast %cst_9 : f32 to vector<1x128xf32>
    %29 = arith.maximumf %28, %27 : vector<1x128xf32>
    %30 = vector.broadcast %cst_10 : f32 to vector<1x128xf32>
    %31 = arith.minimumf %30, %29 : vector<1x128xf32>
    %32 = math.exp %31 : vector<1x128xf32>
    %cst_11 = arith.constant 0.000000e+00 : f32
    %33 = vector.broadcast %cst_11 : f32 to vector<1x128xf32>
    %34 = arith.subf %33, %26 : vector<1x128xf32>
    %cst_12 = arith.constant 1.000000e+00 : f32
    %35 = vector.broadcast %cst_12 : f32 to vector<1x128xf32>
    %36 = arith.subf %35, %32 : vector<1x128xf32>
    %37 = arith.mulf %36, %36 : vector<1x128xf32>
    %38 = arith.mulf %34, %37 : vector<1x128xf32>
    %39 = arith.mulf %38, %31 : vector<1x128xf32>
    %40 = tpu.iota {dimensions = array<i32: 1>} : vector<1x128xi32>
    %c128_i32 = arith.constant 128 : i32
    %41 = arith.muli %arg0, %c128_i32 : i32
    %42 = vector.broadcast %41 : i32 to vector<1x128xi32>
    %43 = arith.addi %40, %42 : vector<1x128xi32>
    %c16_i32 = arith.constant 16 : i32
    %44 = vector.broadcast %c16_i32 : i32 to vector<1x128xi32>
    %45 = arith.cmpi slt, %43, %44 : vector<1x128xi32>
    %cst_13 = arith.constant 0.000000e+00 : f32
    %46 = vector.broadcast %cst_13 : f32 to vector<1x128xf32>
    %47 = arith.select %45, %39, %46 : vector<1x128xi1>, vector<1x128xf32>
    %c0_14 = arith.constant 0 : index
    %c0_15 = arith.constant 0 : index
    %48 = vector.load %arg5[%c0_14, %c0_15] : memref<1x1xf32, #tpu.memory_space<vmem>>, vector<1x1xf32>
    %cst_16 = arith.constant dense<0.000000e+00> : vector<1xf32>
    %49 = vector.multi_reduction <add>, %47, %cst_16 [1] : vector<1x128xf32> to vector<1xf32>
    %50 = vector.shape_cast %49 : vector<1xf32> to vector<1x1xf32>
    %51 = arith.addf %48, %50 : vector<1x1xf32>
    %c0_17 = arith.constant 0 : index
    %c0_18 = arith.constant 0 : index
    %52 = vector.load %arg5[%c0_17, %c0_18] : memref<1x1xf32, #tpu.memory_space<vmem>>, vector<1x1xf32>
    tpu.vector_store %arg5[%c0_17, %c0_18], %51 {strides = array<i32>} : memref<1x1xf32, #tpu.memory_space<vmem>>, vector<1x1xf32>,
    %c0_i32_19 = arith.constant 0 : i32
    %53 = arith.cmpi eq, %arg0, %c0_i32_19 : i32
    %54 = arith.extui %53 : i1 to i32
    %c0_i32_20 = arith.constant 0 : i32
    %55 = arith.cmpi ne, %54, %c0_i32_20 : i32
    scf.if %55 {
      %c0_21 = arith.constant 0 : index
      %c0_22 = arith.constant 0 : index
      %56 = vector.load %arg5[%c0_21, %c0_22] : memref<1x1xf32, #tpu.memory_space<vmem>>, vector<1x1xf32>
      %c0_23 = arith.constant 0 : index
      %c0_24 = arith.constant 0 : index
      %57 = vector.load %arg4[%c0_23, %c0_24] : memref<1x1xf32, #tpu.memory_space<vmem>>, vector<1x1xf32>
      tpu.vector_store %arg4[%c0_23, %c0_24], %56 {strides = array<i32>} : memref<1x1xf32, #tpu.memory_space<vmem>>, vector<1x1xf32>,
    } else {
    }
    return
  }
  func.func @transform_0(%arg0: i32) -> (i32, i32) {
    %c0_i32 = arith.constant 0 : i32
    %c0_i32_0 = arith.constant 0 : i32
    return %c0_i32, %arg0 : i32, i32
  }
  func.func @transform_1(%arg0: i32) -> (i32, i32) {
    %c0_i32 = arith.constant 0 : i32
    %c0_i32_0 = arith.constant 0 : i32
    return %c0_i32, %arg0 : i32, i32
  }
  func.func @transform_2(%arg0: i32) -> (i32, i32) {
    %c0_i32 = arith.constant 0 : i32
    %c0_i32_0 = arith.constant 0 : i32
    %c0_i32_1 = arith.constant 0 : i32
    return %c0_i32, %c0_i32_0 : i32, i32
  }
  func.func @transform_3(%arg0: i32) -> (i32, i32) {
    %c0_i32 = arith.constant 0 : i32
    %c0_i32_0 = arith.constant 0 : i32
    %c0_i32_1 = arith.constant 0 : i32
    return %c0_i32, %c0_i32_0 : i32, i32
  }
}

</mosaic_0001>

<bundles_post_ra>
// kernel: tpu_custom_call.1
= control target key start
LH: loop header
LB: loop body
LE: loop exit
PB: predicated region body
PF: predicated region fallthrough
CT: control target
= control target key end

     0   :  { %v153_v1 = vmov 0   ;;  %vm19_vm0 = vcmask 0   ;;  %v154_v2 = vmov 0.0   ;;  %s204_s0 = inlined_call_operand.vmem [shape: f32[4,128], index: 0, kind: input, shape index: {}]   ;;  %s205_s1 = inlined_call_operand.vmem [shape: s32[1,128], index: 1, kind: input, shape index: {}]   ;;  %s206_s2 = inlined_call_operand.vmem [shape: f32[4,1], index: 2, kind: input, shape index: {}]   ;;  %s207_s3 = inlined_call_operand.hbm [shape: f32[1,1], index: 3, kind: output, shape index: {}]  }
   0x1   :  { %v23_v0 = vld [vmem:[%s206_s2] sm:$0xf]  ;;  %122 = vset.pattern.permute.xlu0 %v153_v1  ;;  %20 = vst.msk [vmem:[#allocation2] sm:$0x1] %vm19_vm0, %v154_v2 }
   0x2   :  { %64 = vperm.xlu0 %122, %v23_v0  }
   0x3   :  { %8 = vsyncpa [#allocation4], 0  ;;  %vm24_vm1 = vcmask 1043456   ;;  %v21_v3 = vld [vmem:[%s204_s0] sm:$0xf]  ;;  %v45_v15 = vlaneseq }
   0x4   :  { %v25_v4 = vsel %vm24_vm1, %v21_v3, -inf  ;;  %v117_v19 = vld [vmem:[%s205_s1] ss:$0 sm:$0xff]  ;;  %s155_s1 = smov [#allocation3]  }
   0x5   :  { %v26_v5 = vrot.slane %v25_v4, 4  ;;  %v46_v17 = vshrl.u32 %v45_v15, 7  ;;  %v86_v52 = vand.u32 127, %v45_v15  ;;  %s109_s16 = sshll.u32 %s155_s1, 4  ;;  %s110_s16 = int_to_ptr.vmem [resolvable:$true] %s109_s16 }
   0x6   :  { %s129_s17 = scalar_lea.vmem %s110_s16, 16  ;;  %s133_s18 = scalar_lea.vmem %s110_s16, 32 }
   0x7   :  { %v27_v6 = vmax.f32 %v25_v4, %v26_v5  ;;  %vm51_vm2 = vcmp.eq.s32.totalorder %v46_v17, %v117_v19  ;;  %vm90_vm3 = vcmp.lt.s32.totalorder %v86_v52, 16  ;;  %p130_p0 = scmp.ne.s32.totalorder %s110_s16, %s129_s17  ;;  %p134_p1 = scmp.lt.s32.totalorder %s110_s16, %s110_s16 }
   0x8   :  { %v118_v21 = vsel %vm51_vm2, 1.0, %v154_v2  ;;  %v92_v57 = vld [vmem:[#allocation2] sm:$0x1]  ;;  %p135_p2 = scmp.lt.s32.totalorder %s133_s18, %s129_s17 }
   0x9   :  { %v28_v7 = vrot.slane %v27_v6, 2  ;;  %v54_v23 = vmul.f32 %v118_v21, %v21_v3 }
   0xa   :  { %p136_p3 = por %p135_p2, %p134_p1 }
   0xb   :  { %v29_v8 = vmax.f32 %v27_v6, %v28_v7  ;;  %v55_v25 = vsel %vm24_vm1, %v54_v23, 0.0 }
   0xc   :  { %v56_v27 = vrot.slane %v55_v25, 4  ;;  %p137_p4 = pnand %p136_p3, %p130_p0 }
   0xd   :  { %v30_v9 = vrot.slane %v29_v8, 1 }
   0xe   :  { %v57_v28 = vadd.f32 %v56_v27, %v55_v25 }
   0xf   :  { %v31_v10 = vmax.f32 %v29_v8, %v30_v9 }
  0x10   :  { %v58_v29 = vrot.slane %v57_v28, 2 }
  0x11   :  { %v32_v11 = vsub.f32 %v21_v3, %v31_v10 }
  0x12   :  { %v59_v30 = vadd.f32 %v58_v29, %v57_v28 }
  0x13   :  { %v33_v12 = vmul.f32 1.442695, %v32_v11 }
  0x14   :  { %v60_v33 = vrot.slane %v59_v30, 1 }
  0x15   :  { %123 = vpow2.f32 %v33_v12 }
  0x16   :  { %v61_v35 = vadd.f32 %v60_v33, %v59_v30 }
  0x1f   :  { %v124_v13 = vpop.eup %123 }
  0x20   :  { %v35_v14 = vsel %vm24_vm1, %v124_v13, 0.0 }
  0x21   :  { %v36_v16 = vrot.slane %v35_v14, 4 }
  0x23   :  { %v37_v18 = vadd.f32 %v36_v16, %v35_v14 }
  0x25   :  { %v38_v20 = vrot.slane %v37_v18, 2 }
  0x27   :  { %v39_v22 = vadd.f32 %v38_v20, %v37_v18 }
  0x29   :  { %v40_v24 = vrot.slane %v39_v22, 1 }
  0x2b   :  { %v41_v26 = vadd.f32 %v40_v24, %v39_v22 }
  0x2d   :  { %125 = vlog2.f32 %v41_v26 }
  0x37   :  { %v126_v31 = vpop.eup %125 }
  0x38   :  { %v43_v32 = vmul.f32 0.6931472, %v126_v31 }
  0x3a   :  { %v44_v34 = vadd.f32 %v43_v32, %v31_v10 }
  0x3c   :  { %v75_v36 = vsub.f32 %v61_v35, %v44_v34 }
  0x3e   :  { %v76_v37 = vmax.f32 %v75_v36, -9.2103405 }
  0x40   :  { %v77_v38 = vmin.f32 %v76_v37, 0.0 }
  0x42   :  { %v78_v39 = vmul.f32 1.442695, %v77_v38 }
  0x44   :  { %127 = vpow2.f32 %v78_v39 }
  0x4e   :  { %v128_v45 = vpop.eup %127 }
  0x4f   :  { %v81_v48 = vsub.f32 1.0, %v128_v45 }
  0x51   :  { %v82_v51 = vmul.f32 %v81_v48, %v81_v48 }
  0x81   :  { %v65_v40 = vpop.permute.xlu0 %64 }
  0x82   :  { %v67_v41 = vmul.f32 %v118_v21, %v65_v40 }
  0x84   :  { %v68_v42 = vsel %vm24_vm1, %v67_v41, 0.0 }
  0x85   :  { %v69_v43 = vrot.slane %v68_v42, 4 }
  0x87   :  { %v70_v44 = vadd.f32 %v69_v43, %v68_v42 }
  0x89   :  { %v71_v46 = vrot.slane %v70_v44, 2 }
  0x8b   :  { %v72_v47 = vadd.f32 %v71_v46, %v70_v44 }
  0x8d   :  { %v73_v49 = vrot.slane %v72_v47, 1 }
  0x8f   :  { %v74_v50 = vadd.f32 %v73_v49, %v72_v47 }
  0x91   :  { %v80_v53 = vsub.f32 0.0, %v74_v50 }
  0x93   :  { %v83_v54 = vmul.f32 %v82_v51, %v80_v53 }
  0x95   :  { %v84_v55 = vmul.f32 %v83_v54, %v77_v38 }
  0x97   :  { %v91_v56 = vsel %vm90_vm3, %v84_v55, 0.0 }
  0x98   :  { %93 = vadd.xlane.f32.xlu0 %v91_v56 }
 0x125   :  { %v94_v58 = vpop.xlane.xlu0 %93 }
 0x126   :  { %v95_v59 = vadd.f32 %v94_v58, %v92_v57 }
 0x128   :  { %97 = vst.msk [vmem:[#allocation2] sm:$0x1] %vm19_vm0, %v95_v59 }
 0x12f   :  { %v101_v60 = vld [vmem:[#allocation2] sm:$0x1] }
 0x130   :  { %102 = vst.msk [vmem:[#allocation3] sm:$0x1] %vm19_vm0, %v101_v60 }
 0x131   :  { %140 = shalt.err (!%p137_p4)
}
 0x132   :  { %s141_s21 = scalar_lea.hbm %s207_s3, 16 }
 0x133   :  { %p142_p5 = scmp.ne.s32.totalorder %s207_s3, %s141_s21  ;;  %p145_p6 = scmp.lt.u32.totalorder %s141_s21, %s207_s3 }
 0x135   :  { %p147_p7 = pnand %p145_p6, %p142_p5 }
 0x137   :  { %150 = shalt.err (!%p147_p7)
}
 0x138   :  { %112 = dma.vmem_to_hbm [thread:$0]  %s110_s16, 16, %s207_s3, [#allocation4]  }
 0x139   :  { %151 = dma.done.wait [#allocation4], 16  }
 0x13a   :  { %152 = vsyncadd [#allocation4], 4294967280 }
 0x13b   :  { %116 = vsyncpa [#allocation4], 1 }

</bundles_post_ra>
